<compile_context>
chip_gen: v5e
topology: v5e:2x2
jax: 0.10.0
libtpu: 0.0.40
codegen_flags: <defaults>
</compile_context>

<pallas_src>
import jax
import jax.numpy as jnp
from jax import lax
from jax.experimental import pallas as pl
from jax.experimental.pallas import tpu as pltpu


# ----------------------------------------------------------------------------
# helpers
# ----------------------------------------------------------------------------
def _round_up(x, m):
    return ((x + m - 1) // m) * m


def _vmem_cap_bytes():
    """~75% of physical per-core VMEM: ~48 MiB on v7x, ~96 MiB on v5e/v6e."""
    try:
        phys = int(pltpu.get_tpu_info().vmem_capacity_bytes)
    except Exception:
        phys = 64 << 20            # conservative default (v7x-sized VMEM)
    return (phys // 4) * 3


def _detect_core_splits():
    """2 partial aggregates on v7x (2 TensorCores/chip), else 1."""
    try:
        kind = jax.devices()[0].device_kind.lower()
    except Exception:
        return 1
    return 2 if "v7" in kind else 1


def _edge_vmem_estimate(te, n2, h, din):
    """Rough, padding-aware VMEM bytes for the edge kernel at tile width te."""
    lane = 128
    h_l = _round_up(h, lane)
    d_l = _round_up(din, lane)
    n1 = n2 // 2
    est = 2 * 2 * 8 * te * 4           # src/dst index tiles (dbl-buffered, 8-sublane pad)
    est += 2 * te * h_l * 2            # precomputed edge-term tiles (dbl-buffered bf16)
    est += n2 * te * 4                 # hoisted iota scratch
    est += 2 * n2 * te * 4             # combined one-hot temporaries (compare + bf16)
    est += 6 * te * h_l * 4            # (TE, H) f32 message temporaries
    est += n2 * h_l * 2                # stacked [xs; xd] scratch
    est += 3 * n1 * h_l * 4            # agg scratch + partial-agg block
    est += n1 * d_l * 4                # resident node features
    est += 4 << 20                     # params / misc / headroom
    return est


def _choose_edge_tile(e, n2, h, din, cap):
    """Largest multiple of 128 in [128, 2048] fitting the VMEM cap, clamped to E."""
    limit = max(128, _round_up(max(e, 1), 128))
    best = 128
    for cand in range(min(2048, limit), 127, -128):
        if _edge_vmem_estimate(cand, n2, h, din) <= cap:
            best = cand
            break
    return best


def _pack_head_params(params):
    """Packs update + MLP-head params into one (rows, 10) f32 buffer.

    Each param starts at a row offset that is a multiple of 8 so in-kernel
    slices are sublane-aligned.  Returns (buffer, offsets) with
    offsets[i] = (row, nrows, ncols).
    """
    head = params[4:]   # wux, wua, bu, w1, b1, w2, b2, w3, b3, w4, b4
    cols = 10
    offsets, rows = [], 0
    for p in head:
        offsets.append((rows, int(p.shape[0]), int(p.shape[1])))
        rows += _round_up(int(p.shape[0]), 8)
    buf = jnp.zeros((rows, cols), jnp.float32)
    for p, (r, nr, nc) in zip(head, offsets):
        buf = buf.at[r:r + nr, 0:nc].set(p.astype(jnp.float32))
    return buf, tuple(offsets)


# ----------------------------------------------------------------------------
# kernels
# ----------------------------------------------------------------------------
def _make_edge_kernel(n_pad):
    """Edge phase: gather + message + scatter-sum, per (split, edge-tile)."""

    def edge_kernel(src_ref, dsts_ref, em_ref, x_ref, wms_ref, wmd_ref,
                    pagg_ref, agg_ref, xsd_ref, iota_ref):
        k = pl.program_id(1)
        te = src_ref.shape[1]

        # --- once per split: zero accumulator, hoist node-side matmuls, iota.
        @pl.when(k == 0)
        def _init():
            x = x_ref[...]
            agg_ref[...] = jnp.zeros_like(agg_ref)
            xsd_ref[0:n_pad, :] = jnp.dot(
                x, wms_ref[...], preferred_element_type=jnp.float32
            ).astype(jnp.bfloat16)
            xsd_ref[n_pad:, :] = jnp.dot(
                x, wmd_ref[...], preferred_element_type=jnp.float32
            ).astype(jnp.bfloat16)
            iota_ref[...] = lax.broadcasted_iota(jnp.int32, (2 * n_pad, te), 0)

        # --- combined one-hot: rows [0, N) match src, rows [N, 2N) match dst+N.
        # Padded edges carry src = N, dst+N = 2N -> all-zero columns.
        rows = iota_ref[...]                                   # (2N, TE) i32
        idx = jnp.where(rows < n_pad, src_ref[...], dsts_ref[...])
        oh = (idx == rows).astype(jnp.bfloat16)                # (2N, TE)

        # Gather xs[src] + xd[dst] in ONE MXU push: (2N, TE)^T @ (2N, H).
        dn = (((0,), (0,)), ((), ()))
        m = lax.dot_general(oh, xsd_ref[...], dn,
                            preferred_element_type=jnp.float32)   # (TE, H)

        # Message: relu(gathered node terms + precomputed edge term (W_e e + b_m)).
        msg = jnp.maximum(m + em_ref[...].astype(jnp.float32), 0.0)

        # Scatter-sum onto destination nodes via the dst half of the one-hot.
        agg_ref[...] += jnp.dot(oh[n_pad:, :], msg.astype(jnp.bfloat16),
                                preferred_element_type=jnp.float32)

        # --- last tile of this split: publish the partial aggregate.
        @pl.when(k == pl.num_programs(1) - 1)
        def _flush():
            pagg_ref[...] = agg_ref[...]

    return edge_kernel


def _make_head_kernel(offsets):
    """Merge partial aggregates + MPL update + lin1..lin4 + pooling."""

    def head_kernel(pagg_ref, x_ref, batch_ref, pk_ref, out_ref):
        g = out_ref.shape[0]
        n_pad = x_ref.shape[0]

        agg = jnp.sum(pagg_ref[...], axis=0)                   # (N, H) f32
        x = x_ref[...]
        pk = pk_ref[...]

        def par(i):
            r, nr, nc = offsets[i]
            return pk[r:r + nr, 0:nc]

        wux, wua, bu = par(0), par(1), par(2)
        w1, b1, w2, b2 = par(3), par(4), par(5), par(6)
        w3, b3, w4, b4 = par(7), par(8), par(9), par(10)

        h = (jnp.dot(x, wux, preferred_element_type=jnp.float32)
             + jnp.dot(agg, wua, preferred_element_type=jnp.float32)
             + bu)                                              # (N, 10)
        h = jax.nn.sigmoid(
            jnp.dot(h, w1, preferred_element_type=jnp.float32) + b1)
        h = jax.nn.sigmoid(
            jnp.dot(h, w2, preferred_element_type=jnp.float32) + b2)  # (N, 5)

        # segment_coo(x, batch, reduce='sum'): one-hot (G, N) @ (N, 5).
        # Padded nodes have batch id == G -> zero one-hot row -> no effect.
        iota_gn = lax.broadcasted_iota(jnp.int32, (g, n_pad), 0)
        oh_b = (batch_ref[...] == iota_gn).astype(jnp.float32)
        pooled = jnp.dot(oh_b, h, preferred_element_type=jnp.float32)

        h = jax.nn.sigmoid(
            jnp.dot(pooled, w3, preferred_element_type=jnp.float32) + b3)
        out_ref[...] = (
            jnp.dot(h, w4, preferred_element_type=jnp.float32) + b4)

    return head_kernel


# ----------------------------------------------------------------------------
# wrapper
# ----------------------------------------------------------------------------
def model13_forward(edge_index, node_attr, edge_attr, batch, num_graphs, params,
                    edge_tile=None, core_splits=None):
    """Pads / precomputes inputs and launches the two Pallas calls."""
    N, Din = node_attr.shape
    E = int(edge_attr.shape[0])
    G = int(num_graphs)
    H = int(params[0].shape[1])

    params = tuple(jnp.asarray(p, jnp.float32) for p in params)
    wms, wmd, wme, bm = params[0], params[1], params[2], params[3]

    N_pad = _round_up(max(int(N), 1), 16)   # bf16 sublane pack -> free dst-half slice
    cap = _vmem_cap_bytes()

    if edge_tile is None:
        TE = _choose_edge_tile(E, 2 * N_pad, H, Din, cap)
    else:
        TE = max(128, _round_up(int(edge_tile), 128))

    n_tiles = max(1, -(-E // TE))           # >= 1 even when E == 0
    if core_splits is None:
        S = _detect_core_splits()
        if n_tiles < 2:
            S = 1                           # nothing to split across cores
    else:
        S = max(1, int(core_splits))
    n_half = -(-n_tiles // S)
    E_pad = S * n_half * TE

    # ---- padded / precomputed device inputs --------------------------------
    src = jnp.full((1, E_pad), N_pad, jnp.int32).at[0, :E].set(
        edge_index[0].astype(jnp.int32))
    dsts = jnp.full((1, E_pad), 2 * N_pad, jnp.int32).at[0, :E].set(
        edge_index[1].astype(jnp.int32) + N_pad)
    # Edge term W_e e + b_m precomputed once (removes the K=3 MXU push per tile).
    em_real = (edge_attr.astype(jnp.float32) @ wme + bm).astype(jnp.bfloat16)
    em = jnp.zeros((E_pad, H), jnp.bfloat16).at[:E, :].set(em_real)
    x_pad = jnp.zeros((N_pad, Din), jnp.float32).at[:N, :].set(
        node_attr.astype(jnp.float32))
    batch_row = jnp.full((1, N_pad), G, jnp.int32).at[0, :N].set(
        batch.astype(jnp.int32))
    head_pk, head_off = _pack_head_params(params)

    # ---- call 1: edge phase -------------------------------------------------
    vmem_bytes = int(min(cap, max(_edge_vmem_estimate(TE, 2 * N_pad, H, Din),
                                  32 << 20)))
    extra = {}
    if TE < 512 and _edge_vmem_estimate(512, 2 * N_pad, H, Din) > cap:
        # Only when VMEM pressure prevents TE >= 512: hide DMA latency instead.
        extra = dict(pipeline_mode=pl.Buffered(3))

    edge_idx_map = lambda p, k: (0, p * n_half + k)
    em_idx_map = lambda p, k: (p * n_half + k, 0)

    flops = int(S * n_half * (2 * TE * (2 * N_pad) * H + 2 * N_pad * TE * H)
                + S * 2 * 2 * N_pad * Din * H)
    cost = pl.CostEstimate(
        flops=flops,
        transcendentals=0,
        bytes_accessed=int(E_pad * (8 + H * 2) + N_pad * Din * 4
                           + 2 * Din * H * 4 + S * N_pad * H * 4))

    partial_agg = pl.pallas_call(
        _make_edge_kernel(N_pad),
        out_shape=jax.ShapeDtypeStruct((S, N_pad, H), jnp.float32),
        grid_spec=pltpu.PrefetchScalarGridSpec(
            num_scalar_prefetch=0,
            grid=(S, n_half),
            in_specs=[
                pl.BlockSpec((1, TE), edge_idx_map, **extra),     # src indices
                pl.BlockSpec((1, TE), edge_idx_map, **extra),     # dst indices (+N)
                pl.BlockSpec((TE, H), em_idx_map, **extra),       # W_e e + b_m (bf16)
                pl.BlockSpec((N_pad, Din), lambda p, k: (0, 0)),  # node feats
                pl.BlockSpec((Din, H), lambda p, k: (0, 0)),      # W_s
                pl.BlockSpec((Din, H), lambda p, k: (0, 0)),      # W_d
            ],
            out_specs=pl.BlockSpec((None, N_pad, H), lambda p, k: (p, 0, 0)),
            scratch_shapes=[
                pltpu.VMEM((N_pad, H), jnp.float32),          # agg accumulator
                pltpu.VMEM((2 * N_pad, H), jnp.bfloat16),     # stacked [xs; xd]
                pltpu.VMEM((2 * N_pad, TE), jnp.int32),       # hoisted iota
            ],
        ),
        compiler_params=pltpu.CompilerParams(
            dimension_semantics=("parallel", "arbitrary"),
            vmem_limit_bytes=vmem_bytes),
        cost_estimate=cost,
    )(src, dsts, em, x_pad, wms, wmd)

    # ---- call 2: merge partials + node update + MLP head + pooling ----------
    out = pl.pallas_call(
        _make_head_kernel(head_off),
        out_shape=jax.ShapeDtypeStruct((G, 1), jnp.float32),
        grid_spec=pltpu.PrefetchScalarGridSpec(
            num_scalar_prefetch=0,
            grid=(1,),
            in_specs=[
                pl.BlockSpec((S, N_pad, H), lambda i: (0, 0, 0)),
                pl.BlockSpec((N_pad, Din), lambda i: (0, 0)),
                pl.BlockSpec((1, N_pad), lambda i: (0, 0)),
                pl.BlockSpec(head_pk.shape, lambda i: (0, 0)),
            ],
            out_specs=pl.BlockSpec((G, 1), lambda i: (0, 0)),
        ),
        compiler_params=pltpu.CompilerParams(
            dimension_semantics=("arbitrary",)),
    )(partial_agg, x_pad, batch_row, head_pk)
    return out


# ----------------------------------------------------------------------------
# pure-JAX reference + params
# ----------------------------------------------------------------------------
def model13_reference(edge_index, node_attr, edge_attr, batch, num_graphs, params):
    (wms, wmd, wme, bm, wux, wua, bu,
     w1, b1, w2, b2, w3, b3, w4, b4) = params
    src, dst = edge_index[0], edge_index[1]
    x = node_attr.astype(jnp.float32)
    ea = edge_attr.astype(jnp.float32)
    msg = jnp.maximum(x[src] @ wms + x[dst] @ wmd + ea @ wme + bm, 0.0)
    agg = jnp.zeros((x.shape[0], msg.shape[1]), jnp.float32).at[dst].add(msg)
    h = x @ wux + agg @ wua + bu
    h = jax.nn.sigmoid(h @ w1 + b1)
    h = jax.nn.sigmoid(h @ w2 + b2)
    pooled = jnp.zeros((num_graphs, h.shape[1]), jnp.float32).at[batch].add(h)
    h = jax.nn.sigmoid(pooled @ w3 + b3)
    return h @ w4 + b4


def init_params(key, din, de, hidden=16):
    """Deterministic parameter init (shapes follow Model13.__init__)."""
    def u(k, shape):
        return jax.random.uniform(k, shape, jnp.float32, -0.2, 0.2)
    ks = jax.random.split(key, 15)
    return (
        u(ks[0], (din, hidden)),    # W_s  (message, src)
        u(ks[1], (din, hidden)),    # W_d  (message, dst)
        u(ks[2], (de, hidden)),     # W_e  (message, edge)
        u(ks[3], (1, hidden)),      # b_m
        u(ks[4], (din, 10)),        # W_ux (update, node)
        u(ks[5], (hidden, 10)),     # W_ua (update, agg)
        u(ks[6], (1, 10)),          # b_u
        u(ks[7], (10, 10)),         # lin1
        u(ks[8], (1, 10)),
        u(ks[9], (10, 5)),          # lin2
        u(ks[10], (1, 5)),
        u(ks[11], (5, 5)),          # lin3
        u(ks[12], (1, 5)),
        u(ks[13], (5, 1)),          # lin4
        u(ks[14], (1, 1)),
    )


if __name__ == "__main__":
    key = jax.random.PRNGKey(0)
    k_ei, k_na, k_ea, k_p = jax.random.split(key, 4)

    N, E, G = 16, 200, 2          # nodes, edges, graphs
    DIN, DE = 4, 3                # node / edge feature dims

    edge_index = jax.random.randint(k_ei, (2, E), 0, N, dtype=jnp.int32)
    node_attr = jax.random.normal(k_na, (N, DIN), jnp.float32)
    edge_attr = jax.random.normal(k_ea, (E, DE), jnp.float32)
    batch = jnp.concatenate([jnp.zeros(N // 2, jnp.int32),
                             jnp.ones(N - N // 2, jnp.int32)])
    params = init_params(k_p, DIN, DE)

    ref = model13_reference(edge_index, node_attr, edge_attr, batch, G, params)

    # 1) auto tile size + auto core-split selection.
    out = jax.block_until_ready(
        model13_forward(edge_index, node_attr, edge_attr, batch, G, params))
    assert out.shape == (G, 1)
    assert jnp.allclose(out, ref, atol=1e-2, rtol=1e-2), (out, ref)

    # 2) forced two-way split (exercises the v7x megacore path on any chip)
    #    plus a non-multiple-of-16 node count (exercises node padding).
    N2, E2, G2 = 20, 37, 3
    ei2 = jax.random.randint(k_ei, (2, E2), 0, N2, dtype=jnp.int32)
    na2 = jax.random.normal(k_na, (N2, DIN), jnp.float32)
    ea2 = jax.random.normal(k_ea, (E2, DE), jnp.float32)
    b2 = jnp.sort(jnp.concatenate([
        jnp.arange(G2, dtype=jnp.int32),
        jax.random.randint(k_p, (N2 - G2,), 0, G2, dtype=jnp.int32)]))
    ref2 = model13_reference(ei2, na2, ea2, b2, G2, params)
    out2 = jax.block_until_ready(
        model13_forward(ei2, na2, ea2, b2, G2, params, core_splits=2))
    assert jnp.allclose(out2, ref2, atol=1e-2, rtol=1e-2), (out2, ref2)

    # 3) zero-edge graph (review concern: grid must still run, output defined).
    ei0 = jnp.zeros((2, 0), jnp.int32)
    ea0 = jnp.zeros((0, DE), jnp.float32)
    ref0 = model13_reference(ei0, node_attr, ea0, batch, G, params)
    out0 = jax.block_until_ready(
        model13_forward(ei0, node_attr, ea0, batch, G, params))
    assert jnp.allclose(out0, ref0, atol=1e-2, rtol=1e-2), (out0, ref0)

    print("KERNEL_OK")
</pallas_src>

<mosaic_0001>
module attributes {stable_mosaic.version = 11 : i64} {
  func.func @edge_kernel(%arg0: i32, %arg1: i32, %arg2: memref<1x256xi32, #tpu.memory_space<vmem>>, %arg3: memref<1x256xi32, #tpu.memory_space<vmem>>, %arg4: memref<256x16xbf16, #tpu.memory_space<vmem>>, %arg5: memref<16x4xf32, #tpu.memory_space<vmem>>, %arg6: memref<4x16xf32, #tpu.memory_space<vmem>>, %arg7: memref<4x16xf32, #tpu.memory_space<vmem>>, %arg8: memref<1x16x16xf32, #tpu.memory_space<vmem>>, %arg9: memref<16x16xf32, #tpu.memory_space<vmem>>, %arg10: memref<32x16xbf16, #tpu.memory_space<vmem>>, %arg11: memref<32x256xi32, #tpu.memory_space<vmem>>) attributes {dimension_semantics = [#tpu.dimension_semantics<parallel>, #tpu.dimension_semantics<arbitrary>], iteration_bounds = array<i64: 1, 1>, scalar_prefetch = 0 : i64, scratch_operands = 3 : i64, tpu.core_type = #tpu.core_type<tc>, window_params = [{transform_indices = @transform_0, window_bounds = array<i64: 1, 256>}, {transform_indices = @transform_1, window_bounds = array<i64: 1, 256>}, {transform_indices = @transform_2, window_bounds = array<i64: 256, 16>}, {pipeline_mode = #tpu.pipeline_mode<synchronous>, transform_indices = @transform_3, window_bounds = array<i64: 16, 4>}, {pipeline_mode = #tpu.pipeline_mode<synchronous>, transform_indices = @transform_4, window_bounds = array<i64: 4, 16>}, {pipeline_mode = #tpu.pipeline_mode<synchronous>, transform_indices = @transform_5, window_bounds = array<i64: 4, 16>}, {transform_indices = @transform_6, window_bounds = array<i64: 1, 16, 16>}]} {
    %c0_i32 = arith.constant 0 : i32
    %0 = arith.cmpi eq, %arg1, %c0_i32 : i32
    %1 = arith.extui %0 : i1 to i32
    %c0_i32_0 = arith.constant 0 : i32
    %2 = arith.cmpi ne, %1, %c0_i32_0 : i32
    scf.if %2 {
      %c0_18 = arith.constant 0 : index
      %c0_19 = arith.constant 0 : index
      %33 = vector.load %arg5[%c0_18, %c0_19] : memref<16x4xf32, #tpu.memory_space<vmem>>, vector<16x4xf32>
      %cst_20 = arith.constant 0.000000e+00 : f32
      %34 = vector.broadcast %cst_20 : f32 to vector<16x16xf32>
      %c0_21 = arith.constant 0 : index
      %c0_22 = arith.constant 0 : index
      %35 = vector.load %arg9[%c0_21, %c0_22] : memref<16x16xf32, #tpu.memory_space<vmem>>, vector<16x16xf32>
      tpu.vector_store %arg9[%c0_21, %c0_22], %34 {strides = array<i32>} : memref<16x16xf32, #tpu.memory_space<vmem>>, vector<16x16xf32>,
      %c0_23 = arith.constant 0 : index
      %c0_24 = arith.constant 0 : index
      %36 = vector.load %arg6[%c0_23, %c0_24] : memref<4x16xf32, #tpu.memory_space<vmem>>, vector<4x16xf32>
      %cst_25 = arith.constant dense<0.000000e+00> : vector<16x16xf32>
      %37 = tpu.matmul %33, %36, %cst_25 {dimension_numbers = #tpu.dot_dimension_numbers<[1], [0], [0], [1], [0, 0, 1, 1], [], []>} : vector<16x4xf32>, vector<4x16xf32>, vector<16x16xf32> -> vector<16x16xf32>
      %38 = arith.truncf %37 : vector<16x16xf32> to vector<16x16xbf16>
      %c0_26 = arith.constant 0 : index
      %c0_27 = arith.constant 0 : index
      %39 = vector.load %arg10[%c0_26, %c0_27] : memref<32x16xbf16, #tpu.memory_space<vmem>>, vector<16x16xbf16>
      tpu.vector_store %arg10[%c0_26, %c0_27], %38 {strides = array<i32>} : memref<32x16xbf16, #tpu.memory_space<vmem>>, vector<16x16xbf16>,
      %c0_28 = arith.constant 0 : index
      %c0_29 = arith.constant 0 : index
      %40 = vector.load %arg7[%c0_28, %c0_29] : memref<4x16xf32, #tpu.memory_space<vmem>>, vector<4x16xf32>
      %cst_30 = arith.constant dense<0.000000e+00> : vector<16x16xf32>
      %41 = tpu.matmul %33, %40, %cst_30 {dimension_numbers = #tpu.dot_dimension_numbers<[1], [0], [0], [1], [0, 0, 1, 1], [], []>} : vector<16x4xf32>, vector<4x16xf32>, vector<16x16xf32> -> vector<16x16xf32>
      %42 = arith.truncf %41 : vector<16x16xf32> to vector<16x16xbf16>
      %c16 = arith.constant 16 : index
      %c0_31 = arith.constant 0 : index
      %43 = vector.load %arg10[%c16, %c0_31] : memref<32x16xbf16, #tpu.memory_space<vmem>>, vector<16x16xbf16>
      tpu.vector_store %arg10[%c16, %c0_31], %42 {strides = array<i32>} : memref<32x16xbf16, #tpu.memory_space<vmem>>, vector<16x16xbf16>,
      %44 = tpu.iota {dimensions = array<i32: 0>} : vector<32x256xi32>
      %c0_32 = arith.constant 0 : index
      %c0_33 = arith.constant 0 : index
      %45 = vector.load %arg11[%c0_32, %c0_33] : memref<32x256xi32, #tpu.memory_space<vmem>>, vector<32x256xi32>
      tpu.vector_store %arg11[%c0_32, %c0_33], %44 {strides = array<i32>} : memref<32x256xi32, #tpu.memory_space<vmem>>, vector<32x256xi32>,
    } else {
    }
    %c0 = arith.constant 0 : index
    %c0_1 = arith.constant 0 : index
    %3 = vector.load %arg11[%c0, %c0_1] : memref<32x256xi32, #tpu.memory_space<vmem>>, vector<32x256xi32>
    %c16_i32 = arith.constant 16 : i32
    %4 = vector.broadcast %c16_i32 : i32 to vector<32x256xi32>
    %5 = arith.cmpi slt, %3, %4 : vector<32x256xi32>
    %c0_2 = arith.constant 0 : index
    %c0_3 = arith.constant 0 : index
    %6 = vector.load %arg2[%c0_2, %c0_3] : memref<1x256xi32, #tpu.memory_space<vmem>>, vector<1x256xi32>
    %c0_4 = arith.constant 0 : index
    %c0_5 = arith.constant 0 : index
    %7 = vector.load %arg3[%c0_4, %c0_5] : memref<1x256xi32, #tpu.memory_space<vmem>>, vector<1x256xi32>
    %8 = vector.shape_cast %6 : vector<1x256xi32> to vector<1x256xi32>
    %9 = vector.broadcast %8 : vector<1x256xi32> to vector<32x256xi32>
    %10 = vector.shape_cast %7 : vector<1x256xi32> to vector<1x256xi32>
    %11 = vector.broadcast %10 : vector<1x256xi32> to vector<32x256xi32>
    %12 = arith.select %5, %9, %11 : vector<32x256xi1>, vector<32x256xi32>
    %13 = arith.cmpi eq, %12, %3 : vector<32x256xi32>
    %14 = arith.extui %13 : vector<32x256xi1> to vector<32x256xi32>
    %15 = arith.sitofp %14 : vector<32x256xi32> to vector<32x256xf32>
    %16 = arith.truncf %15 : vector<32x256xf32> to vector<32x256xbf16>
    %c0_6 = arith.constant 0 : index
    %c0_7 = arith.constant 0 : index
    %17 = vector.load %arg10[%c0_6, %c0_7] : memref<32x16xbf16, #tpu.memory_space<vmem>>, vector<32x16xbf16>
    %cst = arith.constant dense<0.000000e+00> : vector<256x16xf32>
    %18 = tpu.matmul %16, %17, %cst {dimension_numbers = #tpu.dot_dimension_numbers<[0], [0], [1], [1], [0, 1, 1, 1], [], []>} : vector<32x256xbf16>, vector<32x16xbf16>, vector<256x16xf32> -> vector<256x16xf32>
    %c0_8 = arith.constant 0 : index
    %c0_9 = arith.constant 0 : index
    %19 = vector.load %arg4[%c0_8, %c0_9] : memref<256x16xbf16, #tpu.memory_space<vmem>>, vector<256x16xbf16>
    %20 = arith.extf %19 : vector<256x16xbf16> to vector<256x16xf32>
    %21 = arith.addf %18, %20 : vector<256x16xf32>
    %cst_10 = arith.constant 0.000000e+00 : f32
    %22 = vector.broadcast %cst_10 : f32 to vector<256x16xf32>
    %23 = arith.maximumf %21, %22 : vector<256x16xf32>
    %c0_11 = arith.constant 0 : index
    %c0_12 = arith.constant 0 : index
    %24 = vector.load %arg9[%c0_11, %c0_12] : memref<16x16xf32, #tpu.memory_space<vmem>>, vector<16x16xf32>
    %25 = vector.extract_strided_slice %16 {offsets = [16, 0], sizes = [16, 256], strides = [1, 1]} : vector<32x256xbf16> to vector<16x256xbf16>
    %26 = arith.truncf %23 : vector<256x16xf32> to vector<256x16xbf16>
    %cst_13 = arith.constant dense<0.000000e+00> : vector<16x16xf32>
    %27 = tpu.matmul %25, %26, %cst_13 {dimension_numbers = #tpu.dot_dimension_numbers<[1], [0], [0], [1], [0, 0, 1, 1], [], []>} : vector<16x256xbf16>, vector<256x16xbf16>, vector<16x16xf32> -> vector<16x16xf32>
    %28 = arith.addf %24, %27 : vector<16x16xf32>
    %c0_14 = arith.constant 0 : index
    %c0_15 = arith.constant 0 : index
    %29 = vector.load %arg9[%c0_14, %c0_15] : memref<16x16xf32, #tpu.memory_space<vmem>>, vector<16x16xf32>
    tpu.vector_store %arg9[%c0_14, %c0_15], %28 {strides = array<i32>} : memref<16x16xf32, #tpu.memory_space<vmem>>, vector<16x16xf32>,
    %c0_i32_16 = arith.constant 0 : i32
    %30 = arith.cmpi eq, %arg1, %c0_i32_16 : i32
    %31 = arith.extui %30 : i1 to i32
    %c0_i32_17 = arith.constant 0 : i32
    %32 = arith.cmpi ne, %31, %c0_i32_17 : i32
    scf.if %32 {
      %c0_18 = arith.constant 0 : index
      %c0_19 = arith.constant 0 : index
      %33 = vector.load %arg9[%c0_18, %c0_19] : memref<16x16xf32, #tpu.memory_space<vmem>>, vector<16x16xf32>
      %c0_20 = arith.constant 0 : index
      %c0_21 = arith.constant 0 : index
      %c0_22 = arith.constant 0 : index
      %34 = vector.load %arg8[%c0_20, %c0_21, %c0_22] : memref<1x16x16xf32, #tpu.memory_space<vmem>>, vector<1x16x16xf32>
      %35 = vector.shape_cast %34 : vector<1x16x16xf32> to vector<16x16xf32>
      %36 = vector.shape_cast %33 : vector<16x16xf32> to vector<1x16x16xf32>
      tpu.vector_store %arg8[%c0_20, %c0_21, %c0_22], %36 {strides = array<i32>} : memref<1x16x16xf32, #tpu.memory_space<vmem>>, vector<1x16x16xf32>,
    } else {
    }
    return
  }
  func.func @transform_0(%arg0: i32, %arg1: i32) -> (i32, i32) {
    %c1_i32 = arith.constant 1 : i32
    %0 = arith.muli %arg0, %c1_i32 : i32
    %1 = arith.addi %0, %arg1 : i32
    %c0_i32 = arith.constant 0 : i32
    %c0_i32_0 = arith.constant 0 : i32
    return %c0_i32, %1 : i32, i32
  }
  func.func @transform_1(%arg0: i32, %arg1: i32) -> (i32, i32) {
    %c1_i32 = arith.constant 1 : i32
    %0 = arith.muli %arg0, %c1_i32 : i32
    %1 = arith.addi %0, %arg1 : i32
    %c0_i32 = arith.constant 0 : i32
    %c0_i32_0 = arith.constant 0 : i32
    return %c0_i32, %1 : i32, i32
  }
  func.func @transform_2(%arg0: i32, %arg1: i32) -> (i32, i32) {
    %c1_i32 = arith.constant 1 : i32
    %0 = arith.muli %arg0, %c1_i32 : i32
    %1 = arith.addi %0, %arg1 : i32
    %c0_i32 = arith.constant 0 : i32
    %c0_i32_0 = arith.constant 0 : i32
    return %1, %c0_i32 : i32, i32
  }
  func.func @transform_3(%arg0: i32, %arg1: i32) -> (i32, i32) {
    %c0_i32 = arith.constant 0 : i32
    %c0_i32_0 = arith.constant 0 : i32
    %c0_i32_1 = arith.constant 0 : i32
    return %c0_i32, %c0_i32_0 : i32, i32
  }
  func.func @transform_4(%arg0: i32, %arg1: i32) -> (i32, i32) {
    %c0_i32 = arith.constant 0 : i32
    %c0_i32_0 = arith.constant 0 : i32
    %c0_i32_1 = arith.constant 0 : i32
    return %c0_i32, %c0_i32_0 : i32, i32
  }
  func.func @transform_5(%arg0: i32, %arg1: i32) -> (i32, i32) {
    %c0_i32 = arith.constant 0 : i32
    %c0_i32_0 = arith.constant 0 : i32
    %c0_i32_1 = arith.constant 0 : i32
    return %c0_i32, %c0_i32_0 : i32, i32
  }
  func.func @transform_6(%arg0: i32, %arg1: i32) -> (i32, i32, i32) {
    %c0_i32 = arith.constant 0 : i32
    %c0_i32_0 = arith.constant 0 : i32
    %c0_i32_1 = arith.constant 0 : i32
    return %arg0, %c0_i32, %c0_i32_0 : i32, i32, i32
  }
}

</mosaic_0001>

<bundles_post_ra>
// kernel: tpu_custom_call.1
= control target key start
LH: loop header
LB: loop body
LE: loop exit
PB: predicated region body
PF: predicated region fallthrough
CT: control target
= control target key end

     0   :  { %v165_v0 = vlaneseq  ;;  %vm102_vm0 = vcmask 1043456   ;;  %vm95_vm1 = vcmask 31744   ;;  %s960_s0 = inlined_call_operand.vmem [shape: s32[1,256], index: 0, kind: input, shape index: {}]   ;;  %s961_s1 = inlined_call_operand.vmem [shape: s32[1,256], index: 1, kind: input, shape index: {}]   ;;  %s962_s2 = inlined_call_operand.vmem [shape: bf16[256,16], index: 2, kind: input, shape index: {}]   ;;  %s963_s3 = inlined_call_operand.vmem [shape: f32[16,4], index: 3, kind: input, shape index: {}]   ;;  %s964_s4 = inlined_call_operand.vmem [shape: f32[4,16], index: 4, kind: input, shape index: {}]   ;;  %s965_s5 = inlined_call_operand.vmem [shape: f32[4,16], index: 5, kind: input, shape index: {}]   ;;  %s966_s6 = inlined_call_operand.hbm [shape: f32[1,16,16], index: 6, kind: output, shape index: {}]  }
   0x1   :  { %v194_v1 = vld [vmem:[%s960_s0] sm:$0x3] }
   0x2   :  { %v196_v2 = vperm.slane %v194_v1, 0  ;;  %v197_v3 = vperm.slane %v194_v1, 1  ;;  %v134_v4 = vld [vmem:[%s965_s5] sm:$0xf]  ;;  %v166_v5 = vshrl.u32 %v165_v0, 7 }
   0x3   :  { %621 = vmatpush.msk.msra.mxu1 %vm102_vm0, %v134_v4  ;;  %v89_v6 = vld [vmem:[%s963_s3] sm:$0xff] }
   0x4   :  { %v94_v7 = vld [vmem:[%s964_s4] sm:$0xf]  ;;  %622 = vmatmul.msk.f32.vlgmr.msra.gmra.mxu1 %vm95_vm1, %v89_v6 }
   0x5   :  { %v195_v8 = vld [vmem:[%s961_s1] sm:$0x3]  ;;  %618 = vmatpush.msk.msra.mxu0 %vm102_vm0, %v94_v7 }
   0x6   :  { %11 = vsyncpa [#allocation6], 0  ;;  %v167_v9 = vadd.s32 8, %v166_v5  ;;  %vm208_vm2 = vcmp.eq.s32.totalorder %v196_v2, %v166_v5  ;;  %vm209_vm3 = vcmp.eq.s32.totalorder %v197_v3, %v166_v5  ;;  %619 = vmatmul.msk.f32.vlgmr.msra.gmra.mxu0 %vm95_vm1, %v89_v6  ;;  %v772_v10 = vmov 0.0   ;;  %v90_v23 = vld [vmem:[%s963_s3 + $0x8] sm:$0xff]  ;;  %s594_s10 = sshll.u32 %s966_s6, 4  ;;  %s595_s10 = int_to_ptr.hbm [resolvable:$true] %s594_s10 }
   0x7   :  { %v624_v11 = vsel %vm208_vm2, 1.0, %v772_v10  ;;  %v625_v12 = vsel %vm209_vm3, 1.0, %v772_v10  ;;  %v198_v14 = vperm.slane %v195_v8, 0  ;;  %v168_v17 = vadd.s32 16, %v166_v5  ;;  %s774_s11 = smov 128   ;;  %s775_s12 = smov 8  }
   0x8   :  { %vm210_vm4 = vcmp.eq.s32.totalorder %v196_v2, %v167_v9  ;;  %vm211_vm5 = vcmp.eq.s32.totalorder %v197_v3, %v167_v9  ;;  %v232_v13 = vpack.c.bf16 %v625_v12, %v624_v11  ;;  %v199_v18 = vperm.slane %v195_v8, 1  ;;  %v659_v2 = vld [vmem:[%s962_s2] sm:$0xff]  }
   0x9   :  { %v626_v15 = vsel %vm210_vm4, 1.0, %v772_v10  ;;  %v627_v16 = vsel %vm211_vm5, 1.0, %v772_v10  ;;  %v169_v22 = vadd.s32 24, %v166_v5  ;;  %vm212_vm6 = vcmp.eq.s32.totalorder %v198_v14, %v168_v17 }
   0xa   :  { %v233_v19 = vpack.c.bf16 %v627_v16, %v626_v15  ;;  %v308_v20 = vunpack.c.l.b16 %v232_v13  ;;  %v309_v21 = vunpack.c.h.b16 %v232_v13  ;;  %vm213_vm7 = vcmp.eq.s32.totalorder %v199_v18, %v168_v17 }
   0xb   :  { %vm214_vm8 = vcmp.eq.s32.totalorder %v198_v14, %v169_v22  ;;  %vm215_vm9 = vcmp.eq.s32.totalorder %v199_v18, %v169_v22  ;;  %v628_v28 = vsel %vm212_vm6, 1.0, %v772_v10  ;;  %v629_v29 = vsel %vm213_vm7, 1.0, %v772_v10  ;;  %v732_v14 = vld [vmem:[%s962_s2 + $0x58] sm:$0xff]  }
   0xc   :  { %v310_v24 = vunpack.c.l.b16 %v233_v19  ;;  %v311_v25 = vunpack.c.h.b16 %v233_v19  ;;  %623 = vmatmul.msk.f32.gmra.mxu1 %vm95_vm1, %v90_v23  ;;  %v630_v30 = vsel %vm214_vm8, 1.0, %v772_v10  ;;  %v631_v31 = vsel %vm215_vm9, 1.0, %v772_v10 }
   0xd   :  { %v234_v32 = vpack.c.bf16 %v629_v29, %v628_v28  ;;  %v235_v33 = vpack.c.bf16 %v631_v31, %v630_v30  ;;  %vm131_vm10 = vcmask 125952   ;;  %vm360_vm11 = vcmask 261120  }
   0xe   :  { %v316_v26 = vpack.c.b16 %v310_v24, %v308_v20  ;;  %v317_v27 = vpack.c.b16 %v311_v25, %v309_v21  ;;  %620 = vmatmul.msk.f32.gmra.mxu0 %vm95_vm1, %v90_v23  ;;  %v660_v4 = vunpack.c.l.bf16 %v659_v2  ;;  %v661_v5 = vunpack.c.h.bf16 %v659_v2 }
   0xf   :  { %v312_v34 = vunpack.c.l.b16 %v234_v32  ;;  %v313_v35 = vunpack.c.h.b16 %v234_v32  ;;  %v314_v36 = vunpack.c.l.b16 %v235_v33  ;;  %v315_v37 = vunpack.c.h.b16 %v235_v33 }
  0x10   :  { %324 = vxpose.binary.xlu0.c.b16.start [1/4] (short) %v317_v27, %v316_v26, 128  ;;  %v704_v16 = vunpack.c.l.bf16 %v732_v14  ;;  %v705_v17 = vunpack.c.h.bf16 %v732_v14  ;;  %v734_v14 = vld [vmem:[%s962_s2 + $0x68] sm:$0xff]   ;;  %vm91_vm12 = vcmask 130048  }
  0x11   :  { %v841_v38 = vpack.c.b16 %v314_v36, %v312_v34  ;;  %v843_v39 = vpack.c.b16 %v315_v37, %v313_v35  ;;  %92 = vst.msk [vmem:[#allocation2] sm:$0xff] %vm91_vm12, %v772_v10 }
  0x12   :  { %93 = vst.msk [vmem:[#allocation2 + $0x8] sm:$0xff] %vm91_vm12, %v772_v10 }
  0x20   :  { %325 = vxpose.binary.xlu0.c.b16.end [2/4] (short) %v843_v39, %v841_v38, 128 }
  0x81   :  { %v155_v40 = vpop.f32.mrf.mxu1 }
  0x82   :  { %v161_v41 = vpack.c.bf16 %v155_v40, %v155_v40  ;;  %v728_v40 = vld [vmem:[%s962_s2 + $0x38] sm:$0xff]  }
  0x83   :  { %v123_v42 = vpop.f32.mrf.mxu0 }
  0x84   :  { %v129_v43 = vpack.c.bf16 %v123_v42, %v123_v42  ;;  %163 = vst.msk [vmem:[#allocation3 + $0x8] sm:$0xf] %vm131_vm10, %v161_v41 }
  0x86   :  { %132 = vst.msk [vmem:[#allocation3] sm:$0xf] %vm131_vm10, %v129_v43 }
  0x89   :  { %v158_v44 = vpop.f32.mrf.mxu1 }
  0x8a   :  { %v162_v45 = vpack.c.bf16 %v158_v44, %v158_v44  ;;  %v688_v44 = vunpack.c.l.bf16 %v728_v40 }
  0x8b   :  { %v126_v46 = vpop.f32.mrf.mxu0 }
  0x8c   :  { %v130_v47 = vpack.c.bf16 %v126_v46, %v126_v46  ;;  %164 = vst.msk [vmem:[#allocation3 + $0xc] sm:$0xf] %vm131_vm10, %v162_v45  ;;  %v727_v45 = vld [vmem:[%s962_s2 + $0x30] sm:$0xff]  }
  0x8d   :  { %v685_v46 = vunpack.c.h.bf16 %v727_v45 }
  0x8e   :  { %133 = vst.msk [vmem:[#allocation3 + $0x4] sm:$0xf] %vm131_vm10, %v130_v47  ;;  %v689_v47 = vunpack.c.h.bf16 %v728_v40 }
  0x93   :  { %v657_v48 = vld [vmem:[#allocation3 + $0x8] sm:$0xff] }
  0x94   :  { %415 = vmatpush.bf16.msrb.mxu1 %v657_v48  ;;  %738 = vmatpush.bf16.msra.mxu3 %v657_v48 }
  0x95   :  { %v656_v49 = vld [vmem:[#allocation3] sm:$0xff]  ;;  %737 = vmatpush.bf16.msra.mxu2 %v657_v48  ;;  %v736_v48 = vld [vmem:[%s962_s2 + $0x78] sm:$0xff]  }
  0x98   :  { %416 = vmatpush.bf16.msrb.mxu1 %v656_v49  ;;  %740 = vmatpush.bf16.msra.mxu3 %v656_v49 }
  0x99   :  { %739 = vmatpush.bf16.msra.mxu2 %v656_v49  ;;  %v726_v49 = vld [vmem:[%s962_s2 + $0x28] sm:$0xff]  }
  0xbc   :  { %v332_v50 = vpop.trf.xlu0 }
  0xbd   :  { %640 = vmatmul.msk.bf16.vlgmr.msrb.gmra.mxu1 %vm360_vm11, %v332_v50  ;;  %v684_v50 = vunpack.c.l.bf16 %v727_v45 }
  0xc4   :  { %v333_v51 = vpop.trf.xlu0 }
  0xcc   :  { %v334_v52 = vpop.trf.xlu0 }
  0xcd   :  { %641 = vmatmul.msk.bf16.gmra.mxu1 %vm360_vm11, %v334_v52  ;;  %v681_v52 = vunpack.c.h.bf16 %v726_v49 }
  0xd4   :  { %v335_v53 = vpop.trf.xlu0 }
  0xdc   :  { %v336_v54 = vpop.trf.xlu0 }
  0xdd   :  { %642 = vmatmul.msk.bf16.gmra.mxu1 %vm360_vm11, %v336_v54 }
  0xe4   :  { %v337_v55 = vpop.trf.xlu0 }
  0xec   :  { %v338_v56 = vpop.trf.xlu0 }
  0xed   :  { %643 = vmatmul.msk.bf16.gmra.mxu1 %vm360_vm11, %v338_v56 }
  0xf4   :  { %v339_v57 = vpop.trf.xlu0 }
  0xf5   :  { %651 = vmatmul.msk.bf16.vlgmr.msra.gmra.mxu3 %vm360_vm11, %v339_v57  ;;  %v720_v57 = vunpack.c.l.bf16 %v736_v48 }
  0xfc   :  { %v340_v58 = vpop.trf.xlu0 }
  0xfd   :  { %644 = vmatmul.msk.bf16.gmra.mxu1 %vm360_vm11, %v340_v58  ;;  %v725_v58 = vld [vmem:[%s962_s2 + $0x20] sm:$0xff]  }
 0x104   :  { %v341_v59 = vpop.trf.xlu0 }
 0x105   :  { %652 = vmatmul.msk.bf16.gmra.mxu3 %vm360_vm11, %v341_v59  ;;  %v680_v59 = vunpack.c.l.bf16 %v726_v49 }
 0x10c   :  { %v342_v60 = vpop.trf.xlu0 }
 0x10d   :  { %645 = vmatmul.msk.bf16.vlgmr.msra.gmra.mxu2 %vm360_vm11, %v342_v60 }
 0x114   :  { %v343_v61 = vpop.trf.xlu0 }
 0x115   :  { %653 = vmatmul.msk.bf16.gmra.mxu3 %vm360_vm11, %v343_v61  ;;  %v735_v61 = vld [vmem:[%s962_s2 + $0x70] sm:$0xff]  }
 0x116   :  { %v717_v2 = vunpack.c.h.bf16 %v735_v61 }
 0x11c   :  { %v344_v62 = vpop.trf.xlu0 }
 0x11d   :  { %646 = vmatmul.msk.bf16.gmra.mxu2 %vm360_vm11, %v344_v62 }
 0x124   :  { %v345_v63 = vpop.trf.xlu0 }
 0x125   :  { %654 = vmatmul.msk.bf16.gmra.mxu3 %vm360_vm11, %v345_v63 }
 0x12c   :  { %v346_v0 = vpop.trf.xlu0 }
 0x12d   :  { %647 = vmatmul.msk.bf16.gmra.mxu2 %vm360_vm11, %v346_v0  ;;  %v677_v0 = vunpack.c.h.bf16 %v725_v58 }
 0x134   :  { %v347_v1 = vpop.trf.xlu0 }
 0x135   :  { %655 = vmatmul.msk.bf16.gmra.mxu3 %vm360_vm11, %v347_v1 }
 0x13a   :  { %v418_v3 = vpop.f32.mrf.mxu1 }
 0x13b   :  { %v419_v6 = vadd.f32 %v660_v4, %v418_v3 }
 0x13d   :  { %648 = vmatmul.msk.bf16.gmra.mxu2 %vm360_vm11, %v333_v51  ;;  %v498_v9 = vmax.f32 %v419_v6, 0.0 }
 0x142   :  { %v420_v7 = vpop.f32.mrf.mxu1 }
 0x143   :  { %v421_v8 = vadd.f32 %v661_v5, %v420_v7  ;;  %v721_v7 = vunpack.c.h.bf16 %v736_v48 }
 0x145   :  { %v499_v11 = vmax.f32 %v421_v8, 0.0  ;;  %v724_v8 = vld [vmem:[%s962_s2 + $0x18] sm:$0xff]  }
 0x147   :  { %v864_v12 = vpack.c.bf16 %v499_v11, %v498_v9  ;;  %v676_v9 = vunpack.c.l.bf16 %v725_v58 }
 0x14a   :  { %v868_v13 = vpop.f32.mrf.mxu1 }
 0x14d   :  { %649 = vmatmul.msk.bf16.gmra.mxu2 %vm360_vm11, %v335_v53 }
 0x152   :  { %v873_v20 = vpop.f32.mrf.mxu1 }
 0x15a   :  { %v879_v26 = vpop.f32.mrf.mxu1 }
 0x15d   :  { %650 = vmatmul.msk.bf16.gmra.mxu2 %vm360_vm11, %v337_v55 }
 0x162   :  { %v883_v29 = vpop.f32.mrf.mxu1 }
 0x16a   :  { %v887_v32 = vpop.f32.mrf.mxu1 }
 0x172   :  { %v435_v37 = vpop.f32.mrf.mxu1 }
 0x178   :  { %v473_v15 = vpop.f32.mrf.mxu3 }
 0x179   :  { %v474_v18 = vadd.f32 %v704_v16, %v473_v15  ;;  %v716_v16 = vunpack.c.l.bf16 %v735_v61 }
 0x17a   :  { %v438_v43 = vpop.f32.mrf.mxu1 }
 0x17b   :  { %v520_v22 = vmax.f32 %v474_v18, 0.0  ;;  %v439_v45 = vadd.f32 %v676_v9, %v438_v43  ;;  %v722_v43 = vld [vmem:[%s962_s2 + $0x8] sm:$0xff]  }
 0x180   :  { %v475_v19 = vpop.f32.mrf.mxu3 }
 0x181   :  { %v476_v21 = vadd.f32 %v705_v17, %v475_v19  ;;  %v673_v17 = vunpack.c.h.bf16 %v724_v8 }
 0x182   :  { %v440_v3 = vpop.f32.mrf.mxu1 }
 0x183   :  { %v521_v23 = vmax.f32 %v476_v21, 0.0  ;;  %v441_v18 = vadd.f32 %v677_v0, %v440_v3  ;;  %v713_v21 = vunpack.c.h.bf16 %v734_v14 }
 0x185   :  { %v875_v24 = vpack.c.bf16 %v521_v23, %v520_v22 }
 0x188   :  { %v877_v25 = vpop.f32.mrf.mxu3 }
 0x190   :  { %v443_v27 = vpop.f32.mrf.mxu2  ;;  %v881_v28 = vpop.f32.mrf.mxu3 }
 0x191   :  { %v444_v11 = vadd.f32 %v680_v59, %v443_v27  ;;  %v712_v27 = vunpack.c.l.bf16 %v734_v14 }
 0x198   :  { %v445_v30 = vpop.f32.mrf.mxu2  ;;  %v885_v31 = vpop.f32.mrf.mxu3 }
 0x199   :  { %v446_v1 = vadd.f32 %v681_v52, %v445_v30 }
 0x19b   :  { %v509_v19 = vmax.f32 %v446_v1, 0.0 }
 0x1a0   :  { %v448_v33 = vpop.f32.mrf.mxu2  ;;  %v889_v34 = vpop.f32.mrf.mxu3 }
 0x1a1   :  { %v449_v60 = vadd.f32 %v684_v50, %v448_v33 }
 0x1a3   :  { %v510_v15 = vmax.f32 %v449_v60, 0.0  ;;  %v484_v60 = vadd.f32 %v712_v27, %v885_v31 }
 0x1a5   :  { %v524_v31 = vmax.f32 %v484_v60, 0.0  ;;  %v531_v60 = vld [vmem:[#allocation2 + $0x8] sm:$0xff] }
 0x1a8   :  { %v450_v35 = vpop.f32.mrf.mxu2  ;;  %v488_v36 = vpop.f32.mrf.mxu3 }
 0x1a9   :  { %v451_v55 = vadd.f32 %v685_v46, %v450_v35  ;;  %v733_v46 = vld [vmem:[%s962_s2 + $0x60] sm:$0xff]   ;;  %v489_v48 = vadd.f32 %v716_v16, %v488_v36  ;;  %v506_v36 = vmax.f32 %v439_v45, 0.0 }
 0x1aa   :  { %v709_v52 = vunpack.c.h.bf16 %v733_v46  ;;  %v708_v58 = vunpack.c.l.bf16 %v733_v46 }
 0x1ab   :  { %v511_v4 = vmax.f32 %v451_v55, 0.0  ;;  %v526_v61 = vmax.f32 %v489_v48, 0.0 }
 0x1ac   :  { %v481_v0 = vadd.f32 %v709_v52, %v881_v28 }
 0x1ad   :  { %v538_v40 = vpack.c.bf16 %v511_v4, %v510_v15  ;;  %v664_v4 = vunpack.c.l.bf16 %v722_v43 }
 0x1af   :  { %v424_v28 = vadd.f32 %v664_v4, %v868_v13  ;;  %v731_v13 = vld [vmem:[%s962_s2 + $0x50] sm:$0xff]  }
 0x1b0   :  { %v453_v41 = vpop.f32.mrf.mxu2  ;;  %v490_v42 = vpop.f32.mrf.mxu3 }
 0x1b1   :  { %v454_v51 = vadd.f32 %v688_v44, %v453_v41  ;;  %v491_v30 = vadd.f32 %v717_v2, %v490_v42  ;;  %v672_v41 = vunpack.c.l.bf16 %v724_v8  ;;  %v723_v44 = vld [vmem:[%s962_s2 + $0x10] sm:$0xff]   ;;  %v436_v42 = vadd.f32 %v673_v17, %v435_v37 }
 0x1b2   :  { %v669_v50 = vunpack.c.h.bf16 %v723_v44  ;;  %v665_v37 = vunpack.c.h.bf16 %v722_v43 }
 0x1b3   :  { %v512_v62 = vmax.f32 %v454_v51, 0.0  ;;  %v507_v51 = vmax.f32 %v441_v18, 0.0  ;;  %v434_v59 = vadd.f32 %v672_v41, %v887_v32 }
 0x1b5   :  { %v536_v2 = vpack.c.bf16 %v507_v51, %v506_v36  ;;  %v504_v32 = vmax.f32 %v434_v59, 0.0 }
 0x1b8   :  { %v455_v53 = vpop.f32.mrf.mxu2  ;;  %v493_v54 = vpop.f32.mrf.mxu3 }
 0x1b9   :  { %v456_v56 = vadd.f32 %v689_v47, %v455_v53  ;;  %v494_v5 = vadd.f32 %v720_v57, %v493_v54  ;;  %v508_v47 = vmax.f32 %v444_v11, 0.0  ;;  %v486_v53 = vadd.f32 %v713_v21, %v889_v34 }
 0x1ba   :  { %v527_v54 = vmax.f32 %v491_v30, 0.0  ;;  %v668_v57 = vunpack.c.l.bf16 %v723_v44  ;;  %v431_v34 = vadd.f32 %v669_v50, %v883_v29  ;;  %v523_v29 = vmax.f32 %v481_v0, 0.0  ;;  %v730_v30 = vld [vmem:[%s962_s2 + $0x48] sm:$0xff]  }
 0x1bb   :  { %v513_v63 = vmax.f32 %v456_v56, 0.0  ;;  %v528_v33 = vmax.f32 %v494_v5, 0.0  ;;  %v537_v55 = vpack.c.bf16 %v509_v19, %v508_v47  ;;  %v525_v1 = vmax.f32 %v486_v53, 0.0 }
 0x1bc   :  { %v546_v3 = vpack.c.bf16 %v527_v54, %v526_v61  ;;  %v429_v5 = vadd.f32 %v668_v57, %v879_v26  ;;  %v503_v8 = vmax.f32 %v431_v34, 0.0 }
 0x1bd   :  { %v539_v6 = vpack.c.bf16 %v513_v63, %v512_v62  ;;  %v505_v62 = vmax.f32 %v436_v42, 0.0  ;;  %v545_v11 = vpack.c.bf16 %v525_v1, %v524_v31 }
 0x1be   :  { %v502_v14 = vmax.f32 %v429_v5, 0.0 }
 0x1bf   :  { %548 = vmatpush.bf16.msrb.mxu3 %v539_v6  ;;  %v479_v6 = vadd.f32 %v708_v58, %v877_v25  ;;  %v535_v9 = vpack.c.bf16 %v505_v62, %v504_v32  ;;  %v500_v25 = vmax.f32 %v424_v28, 0.0  ;;  %v530_v58 = vld [vmem:[#allocation2] sm:$0xff] }
 0x1c0   :  { %v915_v22 = vpop.f32.mrf.mxu2  ;;  %v495_v23 = vpop.f32.mrf.mxu3  ;;  %v534_v17 = vpack.c.bf16 %v503_v8, %v502_v14 }
 0x1c1   :  { %v496_v35 = vadd.f32 %v721_v7, %v495_v23  ;;  %v426_v7 = vadd.f32 %v665_v37, %v873_v20  ;;  %v522_v15 = vmax.f32 %v479_v6, 0.0  ;;  %v700_v23 = vunpack.c.l.bf16 %v731_v13 }
 0x1c3   :  { %v529_v49 = vmax.f32 %v496_v35, 0.0  ;;  %549 = vmatpush.bf16.msrb.mxu3 %v538_v40  ;;  %v501_v26 = vmax.f32 %v426_v7, 0.0  ;;  %v544_v18 = vpack.c.bf16 %v523_v29, %v522_v15  ;;  %v701_v35 = vunpack.c.h.bf16 %v731_v13 }
 0x1c4   :  { %v696_v40 = vunpack.c.l.bf16 %v730_v30 }
 0x1c5   :  { %v547_v56 = vpack.c.bf16 %v529_v49, %v528_v33  ;;  %v533_v19 = vpack.c.bf16 %v501_v26, %v500_v25  ;;  %v697_v33 = vunpack.c.h.bf16 %v730_v30 }
 0x1c7   :  { %550 = vmatpush.bf16.msrb.mxu3 %v537_v55  ;;  %562 = vmatpush.bf16.msrb.mxu0 %v547_v56 }
 0x1c8   :  { %v460_v63 = vpop.f32.mrf.mxu2 }
 0x1cb   :  { %551 = vmatpush.bf16.msrb.mxu3 %v536_v2  ;;  %563 = vmatpush.bf16.msrb.mxu0 %v546_v3 }
 0x1cf   :  { %552 = vmatpush.bf16.msrb.mxu3 %v535_v9  ;;  %564 = vmatpush.bf16.msrb.mxu0 %v545_v11 }
 0x1d0   :  { %v463_v16 = vpop.f32.mrf.mxu2 }
 0x1d1   :  { %v464_v46 = vadd.f32 %v696_v40, %v463_v16 }
 0x1d3   :  { %553 = vmatpush.bf16.msrb.mxu3 %v534_v17  ;;  %565 = vmatpush.bf16.msrb.mxu0 %v544_v18  ;;  %v516_v52 = vmax.f32 %v464_v46, 0.0 }
 0x1d7   :  { %554 = vmatpush.bf16.msrb.mxu3 %v533_v19  ;;  %566 = vmatpush.bf16.msrb.mxu0 %v875_v24 }
 0x1d8   :  { %v465_v20 = vpop.f32.mrf.mxu2 }
 0x1d9   :  { %v466_v27 = vadd.f32 %v697_v33, %v465_v20 }
 0x1db   :  { %555 = vmatpush.bf16.msrb.mxu3 %v864_v12  ;;  %v729_v12 = vld [vmem:[%s962_s2 + $0x40] sm:$0xff]   ;;  %v517_v50 = vmax.f32 %v466_v27, 0.0  ;;  %s773_s2 = smov [#allocation5]  }
 0x1dc   :  { %v692_v45 = vunpack.c.l.bf16 %v729_v12  ;;  %s592_s7 = sshll.u32 %s773_s2, 4  ;;  %s593_s7 = int_to_ptr.vmem [resolvable:$true] %s592_s7 }
 0x1dd   :  { %v541_v54 = vpack.c.bf16 %v517_v50, %v516_v52 }
 0x1de   :  { %556 = vmatmul.bf16.vlgmr.msrb.gmra.mxu3 %v841_v38  ;;  %v693_v38 = vunpack.c.h.bf16 %v729_v12  ;;  %v459_v51 = vadd.f32 %v692_v45, %v915_v22 }
 0x1e0   :  { %v468_v21 = vpop.f32.mrf.mxu2  ;;  %v461_v49 = vadd.f32 %v693_v38, %v460_v63  ;;  %v514_v55 = vmax.f32 %v459_v51, 0.0 }
 0x1e1   :  { %v469_v41 = vadd.f32 %v700_v23, %v468_v21 }
 0x1e2   :  { %v515_v53 = vmax.f32 %v461_v49, 0.0 }
 0x1e3   :  { %v518_v47 = vmax.f32 %v469_v41, 0.0 }
 0x1e4   :  { %v540_v56 = vpack.c.bf16 %v515_v53, %v514_v55 }
 0x1e8   :  { %v470_v24 = vpop.f32.mrf.mxu2 }
 0x1e9   :  { %v471_v44 = vadd.f32 %v701_v35, %v470_v24 }
 0x1eb   :  { %v519_v48 = vmax.f32 %v471_v44, 0.0 }
 0x1ed   :  { %v542_v42 = vpack.c.bf16 %v519_v48, %v518_v47 }
 0x1ef   :  { %567 = vmatpush.bf16.msrb.mxu0 %v542_v42 }
 0x1f3   :  { %568 = vmatpush.bf16.msrb.mxu0 %v541_v54 }
 0x1f7   :  { %569 = vmatpush.bf16.msrb.mxu0 %v540_v56 }
 0x1fa   :  { %570 = vmatmul.bf16.vlgmr.msrb.gmra.mxu0 %v843_v39 }
 0x261   :  { %v557_v57 = vpop.f32.mrf.mxu3 }
 0x269   :  { %v559_v36 = vpop.f32.mrf.mxu3 }
 0x277   :  { %v571_v22 = vpop.f32.mrf.mxu0 }
 0x278   :  { %v572_v43 = vadd.f32 %v571_v22, %v557_v57 }
 0x27a   :  { %v576_v59 = vadd.f32 %v572_v43, %v530_v58 }
 0x27c   :  { %579 = vst.msk [vmem:[#allocation2] sm:$0xff] %vm91_vm12, %v576_v59 }
 0x27f   :  { %v573_v61 = vpop.f32.mrf.mxu0 }
 0x280   :  { %v574_v37 = vadd.f32 %v573_v61, %v559_v36 }
 0x282   :  { %v577_v34 = vadd.f32 %v574_v37, %v531_v60 }
 0x283   :  { %v584_v39 = vld [vmem:[#allocation2] sm:$0xff] }
 0x284   :  { %580 = vst.msk [vmem:[#allocation2 + $0x8] sm:$0xff] %vm91_vm12, %v577_v34 }
 0x285   :  { %586 = vst.msk [vmem:[#allocation5] sm:$0xff] %vm91_vm12, %v584_v39 }
 0x28b   :  { %v585_v10 = vld [vmem:[#allocation2 + $0x8] sm:$0xff] }
 0x28c   :  { %587 = vst.msk [vmem:[#allocation5 + $0x8] sm:$0xff] %vm91_vm12, %v585_v10 }
 0x28d   :  { %600 = dma.vmem_to_hbm [thread:$0]  %s593_s7, 256, %s595_s10, [#allocation6], %s774_s11, %s774_s11, %s775_s12  }
 0x28e   :  { %770 = dma.done.wait [#allocation6], 256  }
 0x28f   :  { %771 = vsyncadd [#allocation6], 4294967040 }
 0x290   :  { %605 = vsyncpa [#allocation6], 1 }

</bundles_post_ra>
